<compile_context>
chip_gen: v6e
topology: v6e:2x2x1
jax: 0.10.0
libtpu: 0.0.40
codegen_flags: <defaults>
</compile_context>

<pallas_src>
import functools

import jax
import jax.numpy as jnp
from jax.experimental import pallas as pl
from jax.experimental.pallas import tpu as pltpu

_LANE = 128


def _round_up(x, m):
    return ((x + m - 1) // m) * m


# --------------------------------------------------------------------------
# Kernel
# --------------------------------------------------------------------------
def _odefunc_kernel(num_linear, apply_talign, *refs):
    # refs = (y_ref, x_ref, [t_ref], w0y, w0x, b0, w1, b1, ..., out_ref)
    idx = 0
    y_ref = refs[idx]; idx += 1
    x_ref = refs[idx]; idx += 1
    t_ref = None
    if apply_talign:
        t_ref = refs[idx]; idx += 1
    out_ref = refs[-1]

    # Layer 0: hstack([y, X]) @ W0 + b0  ==  y @ W0[:dy] + X @ W0[dy:] + b0
    w0y = refs[idx][...]; idx += 1               # (dy, h1_pad)
    w0x = refs[idx][...]; idx += 1               # (dx, h1_pad)
    b0 = refs[idx][...]; idx += 1                # (1, h1_pad)
    h = (jnp.dot(y_ref[...], w0y, preferred_element_type=jnp.float32)
         + jnp.dot(x_ref[...], w0x, preferred_element_type=jnp.float32)
         + b0)
    if num_linear > 1:
        h = jnp.tanh(h)

    # Remaining layers.
    for l in range(1, num_linear):
        w = refs[idx][...]; idx += 1             # (prev_pad, out_pad or d_out)
        b = refs[idx][...]; idx += 1             # (1, out_pad or d_out)
        h = jnp.dot(h, w, preferred_element_type=jnp.float32) + b
        if l < num_linear - 1:
            h = jnp.tanh(h)

    if apply_talign:
        h = t_ref[...] * h                       # (tm,1) broadcast over lanes

    out_ref[...] = h.astype(out_ref.dtype)


# --------------------------------------------------------------------------
# Parameter preparation (done ONCE, outside the per-step RHS call)
# --------------------------------------------------------------------------
def init_params(config, key):
    """Xavier-normal weights (stored as (in, out)), zero biases."""
    params = []
    for l in range(len(config) - 1):
        fan_in, fan_out = config[l], config[l + 1]
        key, sub = jax.random.split(key)
        std = (2.0 / (fan_in + fan_out)) ** 0.5
        w = std * jax.random.normal(sub, (fan_in, fan_out), dtype=jnp.float32)
        b = jnp.zeros((fan_out,), dtype=jnp.float32)
        params.append((w, b))
    return params


def prepare_params(params, dy):
    """Pad hidden dims to 128 lanes, split W0 into its y / X halves, and
    store biases as (1, out). Padded rows/cols are zero, so padded hidden
    columns stay exactly 0 through every tanh. The LAST layer's output dim
    is left unpadded so the kernel writes the true (N, d_out) result."""
    num_linear = len(params)
    flat = []
    prev_pad = None
    for l, (w, b) in enumerate(params):
        w = jnp.asarray(w, jnp.float32)
        b = jnp.asarray(b, jnp.float32)
        fi, fo = w.shape
        last = (l == num_linear - 1)
        fo_pad = fo if last else _round_up(fo, _LANE)
        b_p = jnp.zeros((1, fo_pad), jnp.float32).at[0, :fo].set(b)
        if l == 0:
            assert 0 < dy < fi, "dy must split the first layer's input dim"
            w_y = jnp.zeros((dy, fo_pad), jnp.float32).at[:, :fo].set(w[:dy])
            w_x = jnp.zeros((fi - dy, fo_pad), jnp.float32).at[:, :fo].set(w[dy:])
            flat += [w_y, w_x, b_p]
        else:
            assert fi <= prev_pad
            w_p = jnp.zeros((prev_pad, fo_pad), jnp.float32).at[:fi, :fo].set(w)
            flat += [w_p, b_p]
        prev_pad = fo_pad
    return flat


# --------------------------------------------------------------------------
# Tiling
# --------------------------------------------------------------------------
def _choose_tile(N, tm):
    n8 = _round_up(N, 8)          # unmasked sublane stores even for odd N
    if n8 <= 256:
        return n8, n8             # small batch: single grid step
    # Large batch: guarantee >= 2 grid steps (v7x dual-TC sharding of the
    # "parallel" axis), tiles capped at tm for v5e/v6e overhead amortization.
    tm_eff = min(tm, _round_up((n8 + 1) // 2, 8))
    tm_eff = _round_up(tm_eff, 8)
    n_pad = _round_up(n8, tm_eff)
    return tm_eff, n_pad


# --------------------------------------------------------------------------
# Forward wrapper
# --------------------------------------------------------------------------
def odefunc_forward(t, y, X, prepared, t_align=None, *, tm=512):
    """Pallas implementation of ODEFunc.forward.

    t is unused by the reference forward (kept for signature parity).
    y: (N, dy), X: (N, dx), t_align: None or (N,) / (N, 1).
    `prepared` is the flat list returned by prepare_params (padded once).
    """
    del t
    num_linear = (len(prepared) - 1) // 2
    dy = prepared[0].shape[0]
    dx = prepared[1].shape[0]
    d_out = prepared[-2].shape[1]

    assert y.ndim == 2 and X.ndim == 2
    assert y.shape[1] == dy and X.shape[1] == dx
    assert y.shape[0] == X.shape[0]
    N = y.shape[0]
    apply_talign = t_align is not None

    tm_eff, N_pad = _choose_tile(N, tm)

    def pad_rows(a):
        if a.shape[0] == N_pad:
            return a
        return jnp.pad(a, ((0, N_pad - a.shape[0]), (0, 0)))

    y_p = pad_rows(jnp.asarray(y, jnp.float32))
    X_p = pad_rows(jnp.asarray(X, jnp.float32))

    inputs = [y_p, X_p]
    in_specs = [
        pl.BlockSpec((tm_eff, dy), lambda i: (i, 0)),
        pl.BlockSpec((tm_eff, dx), lambda i: (i, 0)),
    ]

    if apply_talign:
        t_al = jnp.asarray(t_align, jnp.float32)
        assert t_al.shape in ((N,), (N, 1)), "t_align must be (N,) or (N,1)"
        t_al = pad_rows(t_al.reshape(N, 1))
        inputs.append(t_al)
        in_specs.append(pl.BlockSpec((tm_eff, 1), lambda i: (i, 0)))

    for arr in prepared:
        inputs.append(arr)
        # Constant block: same block index every grid step (DMA'd once).
        in_specs.append(pl.BlockSpec(arr.shape, lambda i: (0, 0)))

    out_spec = pl.BlockSpec((tm_eff, d_out), lambda i: (i, 0))

    kernel = functools.partial(_odefunc_kernel, num_linear, apply_talign)

    out = pl.pallas_call(
        kernel,
        out_shape=jax.ShapeDtypeStruct((N_pad, d_out), jnp.float32),
        grid_spec=pltpu.PrefetchScalarGridSpec(
            num_scalar_prefetch=0,
            grid=(N_pad // tm_eff,),
            in_specs=in_specs,
            out_specs=out_spec,
        ),
        compiler_params=pltpu.CompilerParams(
            # parallel batch axis -> megacore / dual-TC sharding on v7x.
            dimension_semantics=("parallel",)),
    )(*inputs)

    if N_pad != N:
        out = out[:N]
    return out


# --------------------------------------------------------------------------
# Pure-JAX reference
# --------------------------------------------------------------------------
def odefunc_ref(t, y, X, params, t_align=None):
    del t
    h = jnp.concatenate([y, X], axis=1)
    for l, (w, b) in enumerate(params):
        h = h @ w + b
        if l < len(params) - 1:
            h = jnp.tanh(h)
    if t_align is not None:
        h = t_align.reshape(-1, 1) * h
    return h


if __name__ == "__main__":
    key = jax.random.PRNGKey(0)

    # config = [input_dim (= dy+dx), hidden, hidden, output_dim]
    dy, dx = 16, 16
    config = [dy + dx, 32, 32, 16]

    k1, k2, k3, kp = jax.random.split(key, 4)
    params = init_params(config, kp)
    prepared = prepare_params(params, dy)     # padded ONCE, reused every call
    t = jnp.float32(0.0)

    # Case 1: small batch, t_align is None (no t input, no multiply emitted)
    N = 16
    y = jax.random.normal(k1, (N, dy), dtype=jnp.float32)
    X = jax.random.normal(k2, (N, dx), dtype=jnp.float32)
    t_align = jax.random.uniform(k3, (N, 1), dtype=jnp.float32)

    out1 = odefunc_forward(t, y, X, prepared, t_align=None)
    jax.block_until_ready(out1)
    ref1 = odefunc_ref(t, y, X, params, t_align=None)
    assert out1.shape == (N, config[-1])
    assert jnp.allclose(out1, ref1, atol=1e-5, rtol=1e-5)

    # Case 2: small batch with t_align
    out2 = odefunc_forward(t, y, X, prepared, t_align=t_align)
    jax.block_until_ready(out2)
    ref2 = odefunc_ref(t, y, X, params, t_align=t_align)
    assert out2.shape == (N, config[-1])
    assert jnp.allclose(out2, ref2, atol=1e-5, rtol=1e-5)

    # Case 3: odd small batch (exercises round-up-to-8 row padding)
    N3 = 10
    k4, k5 = jax.random.split(jax.random.PRNGKey(1), 2)
    y3 = jax.random.normal(k4, (N3, dy), dtype=jnp.float32)
    X3 = jax.random.normal(k5, (N3, dx), dtype=jnp.float32)
    out3 = odefunc_forward(t, y3, X3, prepared, t_align=None)
    jax.block_until_ready(out3)
    ref3 = odefunc_ref(t, y3, X3, params, t_align=None)
    assert out3.shape == (N3, config[-1])
    assert jnp.allclose(out3, ref3, atol=1e-5, rtol=1e-5)

    # Case 4: larger, non-tile-multiple batch -> >= 2 grid steps + row padding
    N4 = 300
    k6, k7, k8 = jax.random.split(jax.random.PRNGKey(2), 3)
    y4 = jax.random.normal(k6, (N4, dy), dtype=jnp.float32)
    X4 = jax.random.normal(k7, (N4, dx), dtype=jnp.float32)
    t4 = jax.random.uniform(k8, (N4,), dtype=jnp.float32)
    out4 = odefunc_forward(t, y4, X4, prepared, t_align=t4)
    jax.block_until_ready(out4)
    ref4 = odefunc_ref(t, y4, X4, params, t_align=t4)
    assert out4.shape == (N4, config[-1])
    assert jnp.allclose(out4, ref4, atol=1e-5, rtol=1e-5)

    print("KERNEL_OK")
</pallas_src>

<mosaic_0001>
module attributes {stable_mosaic.version = 11 : i64} {
  func.func @_odefunc_kernel(%arg0: i32, %arg1: memref<16x16xf32, #tpu.memory_space<vmem>>, %arg2: memref<16x16xf32, #tpu.memory_space<vmem>>, %arg3: memref<16x128xf32, #tpu.memory_space<vmem>>, %arg4: memref<16x128xf32, #tpu.memory_space<vmem>>, %arg5: memref<1x128xf32, #tpu.memory_space<vmem>>, %arg6: memref<128x128xf32, #tpu.memory_space<vmem>>, %arg7: memref<1x128xf32, #tpu.memory_space<vmem>>, %arg8: memref<128x16xf32, #tpu.memory_space<vmem>>, %arg9: memref<1x16xf32, #tpu.memory_space<vmem>>, %arg10: memref<16x16xf32, #tpu.memory_space<vmem>>) attributes {dimension_semantics = [#tpu.dimension_semantics<parallel>], iteration_bounds = array<i64: 1>, scalar_prefetch = 0 : i64, scratch_operands = 0 : i64, tpu.core_type = #tpu.core_type<tc>, window_params = [{transform_indices = @transform_0, window_bounds = array<i64: 16, 16>}, {transform_indices = @transform_1, window_bounds = array<i64: 16, 16>}, {pipeline_mode = #tpu.pipeline_mode<synchronous>, transform_indices = @transform_2, window_bounds = array<i64: 16, 128>}, {pipeline_mode = #tpu.pipeline_mode<synchronous>, transform_indices = @transform_3, window_bounds = array<i64: 16, 128>}, {pipeline_mode = #tpu.pipeline_mode<synchronous>, transform_indices = @transform_4, window_bounds = array<i64: 1, 128>}, {pipeline_mode = #tpu.pipeline_mode<synchronous>, transform_indices = @transform_5, window_bounds = array<i64: 128, 128>}, {pipeline_mode = #tpu.pipeline_mode<synchronous>, transform_indices = @transform_6, window_bounds = array<i64: 1, 128>}, {pipeline_mode = #tpu.pipeline_mode<synchronous>, transform_indices = @transform_7, window_bounds = array<i64: 128, 16>}, {pipeline_mode = #tpu.pipeline_mode<synchronous>, transform_indices = @transform_8, window_bounds = array<i64: 1, 16>}, {transform_indices = @transform_9, window_bounds = array<i64: 16, 16>}]} {
    %c0 = arith.constant 0 : index
    %c0_0 = arith.constant 0 : index
    %0 = vector.load %arg3[%c0, %c0_0] : memref<16x128xf32, #tpu.memory_space<vmem>>, vector<16x128xf32>
    %c0_1 = arith.constant 0 : index
    %c0_2 = arith.constant 0 : index
    %1 = vector.load %arg4[%c0_1, %c0_2] : memref<16x128xf32, #tpu.memory_space<vmem>>, vector<16x128xf32>
    %c0_3 = arith.constant 0 : index
    %c0_4 = arith.constant 0 : index
    %2 = vector.load %arg5[%c0_3, %c0_4] : memref<1x128xf32, #tpu.memory_space<vmem>>, vector<1x128xf32>
    %c0_5 = arith.constant 0 : index
    %c0_6 = arith.constant 0 : index
    %3 = vector.load %arg1[%c0_5, %c0_6] : memref<16x16xf32, #tpu.memory_space<vmem>>, vector<16x16xf32>
    %cst = arith.constant dense<0.000000e+00> : vector<16x128xf32>
    %4 = tpu.matmul %3, %0, %cst {dimension_numbers = #tpu.dot_dimension_numbers<[1], [0], [0], [1], [0, 0, 1, 1], [], []>} : vector<16x16xf32>, vector<16x128xf32>, vector<16x128xf32> -> vector<16x128xf32>
    %c0_7 = arith.constant 0 : index
    %c0_8 = arith.constant 0 : index
    %5 = vector.load %arg2[%c0_7, %c0_8] : memref<16x16xf32, #tpu.memory_space<vmem>>, vector<16x16xf32>
    %cst_9 = arith.constant dense<0.000000e+00> : vector<16x128xf32>
    %6 = tpu.matmul %5, %1, %cst_9 {dimension_numbers = #tpu.dot_dimension_numbers<[1], [0], [0], [1], [0, 0, 1, 1], [], []>} : vector<16x16xf32>, vector<16x128xf32>, vector<16x128xf32> -> vector<16x128xf32>
    %7 = arith.addf %4, %6 : vector<16x128xf32>
    %8 = vector.broadcast %2 : vector<1x128xf32> to vector<16x128xf32>
    %9 = arith.addf %7, %8 : vector<16x128xf32>
    %10 = math.tanh %9 : vector<16x128xf32>
    %c0_10 = arith.constant 0 : index
    %c0_11 = arith.constant 0 : index
    %11 = vector.load %arg6[%c0_10, %c0_11] : memref<128x128xf32, #tpu.memory_space<vmem>>, vector<128x128xf32>
    %c0_12 = arith.constant 0 : index
    %c0_13 = arith.constant 0 : index
    %12 = vector.load %arg7[%c0_12, %c0_13] : memref<1x128xf32, #tpu.memory_space<vmem>>, vector<1x128xf32>
    %cst_14 = arith.constant dense<0.000000e+00> : vector<16x128xf32>
    %13 = tpu.matmul %10, %11, %cst_14 {dimension_numbers = #tpu.dot_dimension_numbers<[1], [0], [0], [1], [0, 0, 1, 1], [], []>} : vector<16x128xf32>, vector<128x128xf32>, vector<16x128xf32> -> vector<16x128xf32>
    %14 = vector.broadcast %12 : vector<1x128xf32> to vector<16x128xf32>
    %15 = arith.addf %13, %14 : vector<16x128xf32>
    %16 = math.tanh %15 : vector<16x128xf32>
    %c0_15 = arith.constant 0 : index
    %c0_16 = arith.constant 0 : index
    %17 = vector.load %arg8[%c0_15, %c0_16] : memref<128x16xf32, #tpu.memory_space<vmem>>, vector<128x16xf32>
    %c0_17 = arith.constant 0 : index
    %c0_18 = arith.constant 0 : index
    %18 = vector.load %arg9[%c0_17, %c0_18] : memref<1x16xf32, #tpu.memory_space<vmem>>, vector<1x16xf32>
    %cst_19 = arith.constant dense<0.000000e+00> : vector<16x16xf32>
    %19 = tpu.matmul %16, %17, %cst_19 {dimension_numbers = #tpu.dot_dimension_numbers<[1], [0], [0], [1], [0, 0, 1, 1], [], []>} : vector<16x128xf32>, vector<128x16xf32>, vector<16x16xf32> -> vector<16x16xf32>
    %20 = vector.broadcast %18 : vector<1x16xf32> to vector<16x16xf32>
    %21 = arith.addf %19, %20 : vector<16x16xf32>
    %c0_20 = arith.constant 0 : index
    %c0_21 = arith.constant 0 : index
    %22 = vector.load %arg10[%c0_20, %c0_21] : memref<16x16xf32, #tpu.memory_space<vmem>>, vector<16x16xf32>
    tpu.vector_store %arg10[%c0_20, %c0_21], %21 {strides = array<i32>} : memref<16x16xf32, #tpu.memory_space<vmem>>, vector<16x16xf32>,
    return
  }
  func.func @transform_0(%arg0: i32) -> (i32, i32) {
    %c0_i32 = arith.constant 0 : i32
    %c0_i32_0 = arith.constant 0 : i32
    return %arg0, %c0_i32 : i32, i32
  }
  func.func @transform_1(%arg0: i32) -> (i32, i32) {
    %c0_i32 = arith.constant 0 : i32
    %c0_i32_0 = arith.constant 0 : i32
    return %arg0, %c0_i32 : i32, i32
  }
  func.func @transform_2(%arg0: i32) -> (i32, i32) {
    %c0_i32 = arith.constant 0 : i32
    %c0_i32_0 = arith.constant 0 : i32
    %c0_i32_1 = arith.constant 0 : i32
    return %c0_i32, %c0_i32_0 : i32, i32
  }
  func.func @transform_3(%arg0: i32) -> (i32, i32) {
    %c0_i32 = arith.constant 0 : i32
    %c0_i32_0 = arith.constant 0 : i32
    %c0_i32_1 = arith.constant 0 : i32
    return %c0_i32, %c0_i32_0 : i32, i32
  }
  func.func @transform_4(%arg0: i32) -> (i32, i32) {
    %c0_i32 = arith.constant 0 : i32
    %c0_i32_0 = arith.constant 0 : i32
    %c0_i32_1 = arith.constant 0 : i32
    return %c0_i32, %c0_i32_0 : i32, i32
  }
  func.func @transform_5(%arg0: i32) -> (i32, i32) {
    %c0_i32 = arith.constant 0 : i32
    %c0_i32_0 = arith.constant 0 : i32
    %c0_i32_1 = arith.constant 0 : i32
    return %c0_i32, %c0_i32_0 : i32, i32
  }
  func.func @transform_6(%arg0: i32) -> (i32, i32) {
    %c0_i32 = arith.constant 0 : i32
    %c0_i32_0 = arith.constant 0 : i32
    %c0_i32_1 = arith.constant 0 : i32
    return %c0_i32, %c0_i32_0 : i32, i32
  }
  func.func @transform_7(%arg0: i32) -> (i32, i32) {
    %c0_i32 = arith.constant 0 : i32
    %c0_i32_0 = arith.constant 0 : i32
    %c0_i32_1 = arith.constant 0 : i32
    return %c0_i32, %c0_i32_0 : i32, i32
  }
  func.func @transform_8(%arg0: i32) -> (i32, i32) {
    %c0_i32 = arith.constant 0 : i32
    %c0_i32_0 = arith.constant 0 : i32
    %c0_i32_1 = arith.constant 0 : i32
    return %c0_i32, %c0_i32_0 : i32, i32
  }
  func.func @transform_9(%arg0: i32) -> (i32, i32) {
    %c0_i32 = arith.constant 0 : i32
    %c0_i32_0 = arith.constant 0 : i32
    return %arg0, %c0_i32 : i32, i32
  }
}

</mosaic_0001>

<bundles_post_ra>
// kernel: tpu_custom_call.1
= control target key start
LH: loop header
LB: loop body
LE: loop exit
PB: predicated region body
PF: predicated region fallthrough
CT: control target
= control target key end

     0   :  { %14 = vsyncpa [#allocation3], 0  ;;  %s906_s0 = inlined_call_operand.vmem [shape: f32[16,16], index: 0, kind: input, shape index: {}]   ;;  %s907_s1 = inlined_call_operand.hbm [shape: f32[16,16], index: 1, kind: input, shape index: {}]   ;;  %s908_s2 = inlined_call_operand.hbm [shape: f32[16,128], index: 2, kind: input, shape index: {}]   ;;  %s909_s3 = inlined_call_operand.hbm [shape: f32[16,128], index: 3, kind: input, shape index: {}]   ;;  %s910_s4 = inlined_call_operand.vmem [shape: f32[1,128], index: 4, kind: input, shape index: {}]   ;;  %s911_s5 = inlined_call_operand.vmem [shape: f32[128,128], index: 5, kind: input, shape index: {}]   ;;  %s912_s6 = inlined_call_operand.vmem [shape: f32[1,128], index: 6, kind: input, shape index: {}]   ;;  %s913_s7 = inlined_call_operand.vmem [shape: f32[128,16], index: 7, kind: input, shape index: {}]   ;;  %s914_s8 = inlined_call_operand.vmem [shape: f32[1,16], index: 8, kind: input, shape index: {}]   ;;  %s915_s9 = inlined_call_operand.hbm [shape: f32[16,16], index: 9, kind: output, shape index: {}]  }
   0x1   :  { %15 = vsyncpa [#allocation6], 0 }
   0x2   :  { %16 = vsyncpa [#allocation4], 0  ;;  %s709_s30 = smov [#allocation5]   ;;  %s710_s11 = smov [#allocation2]  }
   0x3   :  { %s36_s10 = sshll.u32 %s709_s30, 4  ;;  %s24_s12 = sshll.u32 %s710_s11, 4  ;;  %s37_s10 = int_to_ptr.vmem [resolvable:$true] %s36_s10  ;;  %s25_s12 = int_to_ptr.vmem [resolvable:$true] %s24_s12 }
   0x4   :  { %s631_s13 = scalar_lea.vmem %s37_s10, 256  ;;  %p636_p1 = scmp.lt.s32.totalorder %s37_s10, %s37_s10 }
   0x5   :  { %p632_p0 = scmp.ne.s32.totalorder %s37_s10, %s631_s13  ;;  %p637_p2 = scmp.lt.s32.totalorder %s631_s13, %s631_s13 }
   0x7   :  { %p638_p3 = por %p637_p2, %p636_p1 }
   0x9   :  { %p639_p4 = pnand %p638_p3, %p632_p0 }
   0xb   :  { %642 = shalt.err (!%p639_p4)
}
   0xc   :  { %s711_s14 = smov 128   ;;  %s712_s15 = smov 8  }
   0xd   :  { %42 = dma.hbm_to_vmem [thread:$0]  %s908_s2, 256, %s37_s10, [#allocation6], %s711_s14, %s711_s14, %s712_s15  }
   0xe   :  { %s651_s18 = scalar_lea.vmem %s25_s12, 256  ;;  %p656_p6 = scmp.lt.s32.totalorder %s25_s12, %s25_s12 }
   0xf   :  { %p652_p5 = scmp.ne.s32.totalorder %s25_s12, %s651_s18  ;;  %p657_p7 = scmp.lt.s32.totalorder %s651_s18, %s651_s18 }
  0x11   :  { %p658_p8 = por %p657_p7, %p656_p6 }
  0x13   :  { %p659_p9 = pnand %p658_p8, %p652_p5 }
  0x15   :  { %662 = shalt.err (!%p659_p9)
}
  0x16   :  { %30 = dma.hbm_to_vmem [thread:$0]  %s907_s1, 256, %s25_s12, [#allocation3], %s711_s14, %s711_s14, %s712_s15  }
  0x17   :  { %s713_s21 = smov [#allocation7]  }
  0x18   :  { %s48_s22 = sshll.u32 %s713_s21, 4  ;;  %s49_s22 = int_to_ptr.vmem [resolvable:$true] %s48_s22 }
  0x19   :  { %s671_s23 = scalar_lea.vmem %s49_s22, 256  ;;  %p676_p11 = scmp.lt.s32.totalorder %s49_s22, %s49_s22 }
  0x1a   :  { %p672_p10 = scmp.ne.s32.totalorder %s49_s22, %s671_s23  ;;  %p677_p12 = scmp.lt.s32.totalorder %s671_s23, %s671_s23 }
  0x1c   :  { %p678_p13 = por %p677_p12, %p676_p11 }
  0x1e   :  { %p679_p0 = pnand %p678_p13, %p672_p10 }
  0x20   :  { %682 = shalt.err (!%p679_p0)
}
  0x21   :  { %54 = dma.hbm_to_vmem [thread:$0]  %s909_s3, 256, %s49_s22, [#allocation6], %s711_s14, %s711_s14, %s712_s15  }
  0x22   :  { %703 = dma.done.wait [#allocation3], 256  }
  0x23   :  { %704 = vsyncadd [#allocation3], 4294967040 }
  0x24   :  { %705 = dma.done.wait [#allocation6], 512  }
  0x25   :  { %706 = vsyncadd [#allocation6], 4294966784  ;;  %v77_v0 = vld [vmem:[#allocation7 + $0x8] sm:$0xff]  ;;  %v75_v1 = vld [vmem:[#allocation5 + $0x8] sm:$0xff]  ;;  %vm83_vm0 = vcmask 130048   ;;  %s714_s25 = smov [#allocation8]  }
  0x26   :  { %v76_v2 = vld [vmem:[#allocation7] sm:$0xff]  ;;  %525 = vmatprep.subr.mxu0 %v77_v0  ;;  %532 = vmatprep.subr.mxu1 %v75_v1  ;;  %v74_v3 = vld [vmem:[#allocation5] sm:$0xff]  ;;  %v82_v6 = vld [vmem:[#allocation2 + $0x8] sm:$0xff]  ;;  %s461_s3 = sshll.u32 %s714_s25, 4  ;;  %s462_s3 = int_to_ptr.vmem [resolvable:$true] %s461_s3 }
  0x27   :  { %v81_v4 = vld [vmem:[#allocation2] sm:$0xff]  ;;  %526 = vmatpush3.msra.mxu0 %v77_v0  ;;  %533 = vmatpush3.msra.mxu1 %v75_v1  ;;  %v80_v7 = vld [vmem:[%s906_s0 + $0x8] sm:$0xff]  ;;  %v271_v8 = vld [vmem:[%s911_s5 + $0x78] sm:$0xff]  ;;  %p688_p2 = scmp.lt.s32.totalorder %s462_s3, %s462_s3 }
  0x28   :  { %v79_v5 = vld [vmem:[%s906_s0] sm:$0xff]  ;;  %527 = vmatprep.subr.mxu0 %v76_v2  ;;  %534 = vmatprep.subr.mxu1 %v74_v3  ;;  %v270_v9 = vld [vmem:[%s911_s5 + $0x70] sm:$0xff]  ;;  %v269_v10 = vld [vmem:[%s911_s5 + $0x68] sm:$0xff] }
  0x29   :  { %528 = vmatpush3.msra.mxu0 %v76_v2  ;;  %529 = vmatprep.mubr.msk.f32.mxu0 %vm83_vm0, %v81_v4  ;;  %v268_v11 = vld [vmem:[%s911_s5 + $0x60] sm:$0xff]  ;;  %v267_v12 = vld [vmem:[%s911_s5 + $0x58] sm:$0xff]  ;;  %v266_v13 = vld [vmem:[%s911_s5 + $0x50] sm:$0xff] }
  0x2a   :  { %535 = vmatpush3.msra.mxu1 %v74_v3  ;;  %536 = vmatprep.mubr.msk.f32.mxu1 %vm83_vm0, %v79_v5  ;;  %v265_v14 = vld [vmem:[%s911_s5 + $0x48] sm:$0xff]  ;;  %v264_v15 = vld [vmem:[%s911_s5 + $0x40] sm:$0xff]  ;;  %v263_v16 = vld [vmem:[%s911_s5 + $0x38] sm:$0xff] }
  0x2b   :  { %530 = vmatmul.mubr.msk.f32.vlgmr.msra.gmra.mxu0 %vm83_vm0, %v82_v6  ;;  %537 = vmatmul.mubr.msk.f32.vlgmr.msra.gmra.mxu1 %vm83_vm0, %v80_v7  ;;  %v262_v17 = vld [vmem:[%s911_s5 + $0x30] sm:$0xff]  ;;  %v261_v18 = vld [vmem:[%s911_s5 + $0x28] sm:$0xff]  ;;  %v260_v19 = vld [vmem:[%s911_s5 + $0x20] sm:$0xff] }
  0x2c   :  { %539 = vmatprep.subr.mxu0 %v271_v8  ;;  %v259_v20 = vld [vmem:[%s911_s5 + $0x18] sm:$0xff]  ;;  %v258_v21 = vld [vmem:[%s911_s5 + $0x10] sm:$0xff]  ;;  %v257_v22 = vld [vmem:[%s911_s5 + $0x8] sm:$0xff] }
  0x2d   :  { %540 = vmatpush3.msra.mxu0 %v271_v8  ;;  %v256_v23 = vld [vmem:[%s911_s5] sm:$0xff]  ;;  %v371_v24 = vld [vmem:[%s913_s7 + $0x78] sm:$0xff]  ;;  %v370_v25 = vld [vmem:[%s913_s7 + $0x70] sm:$0xff] }
  0x2e   :  { %541 = vmatprep.subr.mxu0 %v270_v9  ;;  %574 = vmatprep.subr.mxu1 %v371_v24  ;;  %v369_v26 = vld [vmem:[%s913_s7 + $0x68] sm:$0xff]  ;;  %v368_v27 = vld [vmem:[%s913_s7 + $0x60] sm:$0xff]  ;;  %v367_v28 = vld [vmem:[%s913_s7 + $0x58] sm:$0xff] }
  0x2f   :  { %542 = vmatpush3.msra.mxu0 %v270_v9  ;;  %575 = vmatpush3.msra.mxu1 %v371_v24  ;;  %v366_v29 = vld [vmem:[%s913_s7 + $0x50] sm:$0xff]  ;;  %v478_v32 = vld [vmem:[%s910_s4] ss:$0 sm:$0xff]  ;;  %v365_v41 = vld [vmem:[%s913_s7 + $0x48] sm:$0xff] }
  0x30   :  { %543 = vmatprep.subr.mxu0 %v269_v10  ;;  %576 = vmatprep.subr.mxu1 %v370_v25  ;;  %v364_v42 = vld [vmem:[%s913_s7 + $0x40] sm:$0xff]  ;;  %v363_v43 = vld [vmem:[%s913_s7 + $0x38] sm:$0xff]  ;;  %v362_v44 = vld [vmem:[%s913_s7 + $0x30] sm:$0xff] }
  0x31   :  { %544 = vmatpush3.msra.mxu0 %v269_v10  ;;  %577 = vmatpush3.msra.mxu1 %v370_v25  ;;  %v361_v45 = vld [vmem:[%s913_s7 + $0x28] sm:$0xff]  ;;  %v360_v46 = vld [vmem:[%s913_s7 + $0x20] sm:$0xff]  ;;  %v359_v47 = vld [vmem:[%s913_s7 + $0x18] sm:$0xff] }
  0x32   :  { %545 = vmatprep.subr.mxu0 %v268_v11  ;;  %578 = vmatprep.subr.mxu1 %v369_v26  ;;  %v358_v48 = vld [vmem:[%s913_s7 + $0x10] sm:$0xff]  ;;  %v357_v49 = vld [vmem:[%s913_s7 + $0x8] sm:$0xff]  ;;  %v356_v50 = vld [vmem:[%s913_s7] sm:$0xff] }
  0x33   :  { %546 = vmatpush3.msra.mxu0 %v268_v11  ;;  %579 = vmatpush3.msra.mxu1 %v369_v26  ;;  %v479_v51 = vld [vmem:[%s912_s6] ss:$0 sm:$0xff]  ;;  %s683_s6 = scalar_lea.vmem %s462_s3, 256 }
  0x34   :  { %547 = vmatprep.subr.mxu0 %v267_v12  ;;  %580 = vmatprep.subr.mxu1 %v368_v27  ;;  %v480_v58 = vld [vmem:[%s914_s8] ss:$0 sm:$0xff]  ;;  %p684_p1 = scmp.ne.s32.totalorder %s462_s3, %s683_s6  ;;  %p689_p3 = scmp.lt.s32.totalorder %s683_s6, %s683_s6 }
  0x35   :  { %548 = vmatpush3.msra.mxu0 %v267_v12  ;;  %581 = vmatpush3.msra.mxu1 %v368_v27 }
  0x36   :  { %549 = vmatprep.subr.mxu0 %v266_v13  ;;  %582 = vmatprep.subr.mxu1 %v367_v28  ;;  %p690_p4 = por %p689_p3, %p688_p2 }
  0x37   :  { %550 = vmatpush3.msra.mxu0 %v266_v13  ;;  %583 = vmatpush3.msra.mxu1 %v367_v28 }
  0x38   :  { %551 = vmatprep.subr.mxu0 %v265_v14  ;;  %584 = vmatprep.subr.mxu1 %v366_v29  ;;  %p691_p5 = pnand %p690_p4, %p684_p1 }
  0x39   :  { %552 = vmatpush3.msra.mxu0 %v265_v14  ;;  %585 = vmatpush3.msra.mxu1 %v366_v29 }
  0x3a   :  { %553 = vmatprep.subr.mxu0 %v264_v15  ;;  %586 = vmatprep.subr.mxu1 %v365_v41 }
  0x3b   :  { %554 = vmatpush3.msra.mxu0 %v264_v15  ;;  %587 = vmatpush3.msra.mxu1 %v365_v41 }
  0x3c   :  { %555 = vmatprep.subr.mxu0 %v263_v16  ;;  %588 = vmatprep.subr.mxu1 %v364_v42 }
  0x3d   :  { %556 = vmatpush3.msra.mxu0 %v263_v16  ;;  %589 = vmatpush3.msra.mxu1 %v364_v42 }
  0x3e   :  { %557 = vmatprep.subr.mxu0 %v262_v17  ;;  %590 = vmatprep.subr.mxu1 %v363_v43 }
  0x3f   :  { %558 = vmatpush3.msra.mxu0 %v262_v17  ;;  %591 = vmatpush3.msra.mxu1 %v363_v43 }
  0x40   :  { %559 = vmatprep.subr.mxu0 %v261_v18  ;;  %592 = vmatprep.subr.mxu1 %v362_v44 }
  0x41   :  { %560 = vmatpush3.msra.mxu0 %v261_v18  ;;  %593 = vmatpush3.msra.mxu1 %v362_v44 }
  0x42   :  { %561 = vmatprep.subr.mxu0 %v260_v19  ;;  %594 = vmatprep.subr.mxu1 %v361_v45 }
  0x43   :  { %562 = vmatpush3.msra.mxu0 %v260_v19  ;;  %595 = vmatpush3.msra.mxu1 %v361_v45 }
  0x44   :  { %563 = vmatprep.subr.mxu0 %v259_v20  ;;  %596 = vmatprep.subr.mxu1 %v360_v46 }
  0x45   :  { %564 = vmatpush3.msra.mxu0 %v259_v20  ;;  %597 = vmatpush3.msra.mxu1 %v360_v46 }
  0x46   :  { %565 = vmatprep.subr.mxu0 %v258_v21  ;;  %598 = vmatprep.subr.mxu1 %v359_v47 }
  0x47   :  { %566 = vmatpush3.msra.mxu0 %v258_v21  ;;  %599 = vmatpush3.msra.mxu1 %v359_v47 }
  0x48   :  { %567 = vmatprep.subr.mxu0 %v257_v22  ;;  %600 = vmatprep.subr.mxu1 %v358_v48 }
  0x49   :  { %568 = vmatpush3.msra.mxu0 %v257_v22  ;;  %601 = vmatpush3.msra.mxu1 %v358_v48 }
  0x4a   :  { %569 = vmatprep.subr.mxu0 %v256_v23  ;;  %602 = vmatprep.subr.mxu1 %v357_v49 }
  0x4b   :  { %570 = vmatpush3.msra.mxu0 %v256_v23  ;;  %603 = vmatpush3.msra.mxu1 %v357_v49 }
  0x4c   :  { %604 = vmatprep.subr.mxu1 %v356_v50 }
  0x4d   :  { %605 = vmatpush3.msra.mxu1 %v356_v50 }
  0xeb   :  { %v531_v30 = vpop.f32.mrf.mxu0  ;;  %v538_v31 = vpop.f32.mrf.mxu1 }
  0xec   :  { %v243_v33 = vadd.f32 %v538_v31, %v531_v30 }
  0xed   :  { %v156_v34 = vpop.f32.mrf.mxu0  ;;  %v237_v35 = vpop.f32.mrf.mxu1 }
  0xee   :  { %v238_v36 = vadd.f32 %v237_v35, %v156_v34  ;;  %v253_v37 = vadd.f32 %v478_v32, %v243_v33 }
  0xf0   :  { %v252_v38 = vadd.f32 %v478_v32, %v238_v36 }
  0xf2   :  { %615 = vtanh.f32 %v252_v38 }
  0xf3   :  { %617 = vtanh.f32 %v253_v37 }
  0xff   :  { %v616_v39 = vpop.eup %615 }
 0x100   :  { %v618_v40 = vpop.eup %617  ;;  %571 = vmatprep.mubr.f32.mxu0 %v616_v39 }
 0x101   :  { %572 = vmatmul.mubr.f32.vlgmr.msra.gmra.mxu0 %v618_v40 }
 0x1c1   :  { %v573_v52 = vpop.f32.mrf.mxu0 }
 0x1c2   :  { %v351_v53 = vadd.f32 %v573_v52, %v479_v51 }
 0x1c3   :  { %v345_v54 = vpop.f32.mrf.mxu0 }
 0x1c4   :  { %v346_v55 = vadd.f32 %v479_v51, %v345_v54 }
 0x1c6   :  { %619 = vtanh.f32 %v346_v55 }
 0x1c7   :  { %621 = vtanh.f32 %v351_v53 }
 0x1d3   :  { %v620_v56 = vpop.eup %619 }
 0x1d4   :  { %v622_v57 = vpop.eup %621  ;;  %606 = vmatprep.mubr.f32.mxu1 %v620_v56 }
 0x1d5   :  { %607 = vmatmul.mubr.f32.vlgmr.msra.gmra.mxu1 %v622_v57 }
 0x295   :  { %v608_v59 = vpop.f32.mrf.mxu1 }
 0x296   :  { %v451_v60 = vadd.f32 %v608_v59, %v480_v58 }
 0x297   :  { %v445_v61 = vpop.f32.mrf.mxu1 }
 0x298   :  { %455 = vst.msk [vmem:[#allocation8 + $0x8] sm:$0xff] %vm83_vm0, %v451_v60  ;;  %v446_v62 = vadd.f32 %v480_v58, %v445_v61 }
 0x29a   :  { %454 = vst.msk [vmem:[#allocation8] sm:$0xff] %vm83_vm0, %v446_v62 }
 0x29b   :  { %694 = shalt.err (!%p691_p5)
}
 0x29c   :  { %467 = dma.vmem_to_hbm [thread:$0]  %s462_s3, 256, %s915_s9, [#allocation4], %s711_s14, %s711_s14, %s712_s15  }
 0x29d   :  { %707 = dma.done.wait [#allocation4], 256  }
 0x29e   :  { %708 = vsyncadd [#allocation4], 4294967040 }
 0x29f   :  { %471 = vsyncpa [#allocation3], 1 }
 0x2a0   :  { %472 = vsyncpa [#allocation6], 1 }
 0x2a1   :  { %473 = vsyncpa [#allocation4], 1 }

</bundles_post_ra>
